<compile_context>
chip_gen: v6e
topology: v6e:2x2x1
jax: 0.10.0
libtpu: 0.0.40
codegen_flags: <defaults>
</compile_context>

<pallas_src>
import math
import jax
import jax.numpy as jnp
from jax import lax
from jax.experimental import pallas as pl
from jax.experimental.pallas import tpu as pltpu

# ----- small synthetic config (consistent with MsingiConfig fields used) -----
B, S, D = 2, 8, 32          # batch, seq_len, n_embd
H = 4                       # n_head
HD = D // H                 # head_dim
HD2 = HD // 2               # half head_dim (rotary pairs)
F = 4 * D                   # intermediate_size
R = B * S                   # total rows (batch folded into rows)
EPS = 1e-5                  # layer_norm_epsilon
SCALING = HD ** (-0.5)
NEG_BIG = -1e30             # additive mask value for cross-batch score entries
# dropout = 0.0 (eval), use_mixed_precision ignored on TPU (compute in f32)


def _gelu_tanh(x):
    # GELU(approximate='tanh')
    c = math.sqrt(2.0 / math.pi)
    return 0.5 * x * (1.0 + jnp.tanh(c * (x + 0.044715 * x * x * x)))


def msingi_block_kernel(x_ref, cos_ref, sin_ref, bias_ref,
                        ln1g_ref, ln1b_ref, ln2g_ref, ln2b_ref,
                        wqkv_ref, wo_ref, w1_ref, b1_ref, w2_ref, b2_ref,
                        o_ref):
    x = x_ref[...]                                        # (R, D) f32, R = B*S

    # ---------------- LayerNorm 1 ----------------
    mu = jnp.mean(x, axis=-1, keepdims=True)
    var = jnp.mean((x - mu) ** 2, axis=-1, keepdims=True)
    xn = (x - mu) * lax.rsqrt(var + EPS) * ln1g_ref[...] + ln1b_ref[...]

    # ------- fused projection: q | k | v | q_swap | k_swap in one MXU matmul -------
    # Host-side layout (see wrapper): q/k columns de-interleaved per head to
    # [even pair-components | odd pair-components]; q_swap/k_swap are the same columns
    # with the two halves swapped ([odd | even]); SCALING folded into the q columns.
    qkv = jnp.dot(xn, wqkv_ref[...], preferred_element_type=jnp.float32)   # (R, 5D)
    q = qkv[:, 0:D]
    k = qkv[:, D:2 * D]
    v = qkv[:, 2 * D:3 * D]                               # original column layout
    qsw = qkv[:, 3 * D:4 * D]
    ksw = qkv[:, 4 * D:5 * D]

    # ---------------- rotary embedding (pure elementwise, full width) ----------------
    # cos = per-head [cos | cos], sin = per-head [-sin | +sin]  (host-tiled to (R, D))
    cosf = cos_ref[...]
    sinf = sin_ref[...]
    q_rot = q * cosf + qsw * sinf                          # (R, D) rotated, split-half layout
    k_rot = k * cosf + ksw * sinf
    # (the split-half permutation is shared by q and k, so it cancels in q·k)

    bias = bias_ref[...]                                   # (R, R) block-diagonal 0 / -1e30
    wo = wo_ref[...]                                       # (D, D)

    # ---------------- multi-head attention + per-head out-projection accumulate ------
    dn = (((1,), (1,)), ((), ()))                          # contract head_dim of both
    acc = x                                                # residual-initialized accumulator
    for h in range(H):                                     # H = 4, fully static
        c0 = h * HD
        qh = q_rot[:, c0:c0 + HD]
        kh = k_rot[:, c0:c0 + HD]
        vh = v[:, c0:c0 + HD]                              # (R, HD), original order
        s = lax.dot_general(qh, kh, dn,
                            preferred_element_type=jnp.float32) + bias      # (R, R)
        s = s - jnp.max(s, axis=-1, keepdims=True)         # softmax in f32
        p = jnp.exp(s)
        p = p / jnp.sum(p, axis=-1, keepdims=True)         # exact (matches reference)
        oh = jnp.dot(p, vh, preferred_element_type=jnp.float32)             # (R, HD)
        acc = acc + jnp.dot(oh, wo[c0:c0 + HD, :],
                            preferred_element_type=jnp.float32)

    # ---------------- residual + LayerNorm 2 + MLP ----------------
    h1 = acc                                               # x + attn @ Wo
    mu2 = jnp.mean(h1, axis=-1, keepdims=True)
    var2 = jnp.mean((h1 - mu2) ** 2, axis=-1, keepdims=True)
    h1n = (h1 - mu2) * lax.rsqrt(var2 + EPS) * ln2g_ref[...] + ln2b_ref[...]

    inter = jnp.dot(h1n, w1_ref[...], preferred_element_type=jnp.float32) + b1_ref[...]
    inter = _gelu_tanh(inter)
    mlp = jnp.dot(inter, w2_ref[...], preferred_element_type=jnp.float32) + b2_ref[...]

    o_ref[...] = h1 + mlp


@jax.jit
def msingi_block(x, cosf, sinf, bias, ln1g, ln1b, ln2g, ln2b, wqkv, wo, w1, b1, w2, b2):
    x2d = x.reshape(R, D)                                  # fold batch into rows
    n_in = 14
    out2d = pl.pallas_call(
        msingi_block_kernel,
        out_shape=jax.ShapeDtypeStruct((R, D), jnp.float32),
        # gridless: single invocation, every operand is a whole-array VMEM block
        in_specs=[pl.BlockSpec(memory_space=pltpu.VMEM) for _ in range(n_in)],
        out_specs=pl.BlockSpec(memory_space=pltpu.VMEM),
    )(x2d, cosf, sinf, bias, ln1g, ln1b, ln2g, ln2b, wqkv, wo, w1, b1, w2, b2)
    return out2d.reshape(B, S, D)


def _make_rotary_tables():
    # freqs_cis = exp(i * pos * theta_j), theta_j = 10000^(-2j/HD) -> cos/sin (S, HD//2).
    # Tiled over batch rows (row r <-> sequence position r % S) and over the full D width:
    #   COS: per head [cos | cos]        SIN_SIGNED: per head [-sin | +sin]
    pos = jnp.arange(S, dtype=jnp.float32)
    inv_freq = 1.0 / (10000.0 ** (jnp.arange(0, HD, 2, dtype=jnp.float32) / HD))
    ang = pos[:, None] * inv_freq[None, :]                 # (S, HD//2)
    cos_h = jnp.cos(ang)
    sin_h = jnp.sin(ang)
    cos_full = jnp.tile(cos_h, (B, 2 * H))                 # (R, D)
    sin_full = jnp.tile(jnp.concatenate([-sin_h, sin_h], axis=-1), (B, H))   # (R, D)
    return cos_full, sin_full


def _perms():
    # per-head column permutations:
    #   perm      -> [even pair components | odd pair components]
    #   perm_swap -> [odd  pair components | even pair components]
    perm, perm_swap = [], []
    for h in range(H):
        ev = [h * HD + 2 * i for i in range(HD2)]
        od = [h * HD + 2 * i + 1 for i in range(HD2)]
        perm += ev + od
        perm_swap += od + ev
    return jnp.array(perm, dtype=jnp.int32), jnp.array(perm_swap, dtype=jnp.int32)


def _make_batch_bias():
    # additive block-diagonal mask: 0 within the same batch element, -1e30 across batches
    row_b = jnp.repeat(jnp.arange(B, dtype=jnp.int32), S)
    return jnp.where(row_b[:, None] == row_b[None, :], 0.0, NEG_BIG).astype(jnp.float32)


if __name__ == "__main__":
    key = jax.random.PRNGKey(0)
    ks = jax.random.split(key, 10)

    def lin(k, fan_in, shape):
        bound = 1.0 / math.sqrt(fan_in)
        return jax.random.uniform(k, shape, jnp.float32, -bound, bound)

    x = jax.random.normal(ks[0], (B, S, D), jnp.float32)

    # attention projections (bias=False), stored as (in, out) so y = x @ W
    wq = lin(ks[1], D, (D, D))
    wk = lin(ks[2], D, (D, D))
    wv = lin(ks[3], D, (D, D))
    wo = lin(ks[4], D, (D, D))
    # MLP (Linear layers with bias)
    w1 = lin(ks[5], D, (D, F))
    b1 = lin(ks[6], D, (1, F))
    w2 = lin(ks[7], F, (F, D))
    b2 = lin(ks[8], F, (1, D))
    # LayerNorms: default init weight=1, bias=0
    ln1g = jnp.ones((1, D), jnp.float32)
    ln1b = jnp.zeros((1, D), jnp.float32)
    ln2g = jnp.ones((1, D), jnp.float32)
    ln2b = jnp.zeros((1, D), jnp.float32)

    # Host-side weight fusion (free):
    #   (D, 5D) = [ Wq[:,perm]*scaling | Wk[:,perm] | Wv | Wq[:,perm_swap]*scaling | Wk[:,perm_swap] ]
    perm, perm_swap = _perms()
    wqkv = jnp.concatenate([wq[:, perm] * SCALING,
                            wk[:, perm],
                            wv,
                            wq[:, perm_swap] * SCALING,
                            wk[:, perm_swap]], axis=1)

    cosf, sinf = _make_rotary_tables()
    bias = _make_batch_bias()

    # TODO(synk): attention_mask is None here; an additive attention_mask would simply be
    # folded into `bias` host-side (same (R, R) additive-bias path).
    out = msingi_block(x, cosf, sinf, bias, ln1g, ln1b, ln2g, ln2b,
                       wqkv, wo, w1, b1, w2, b2)
    jax.block_until_ready(out)
    assert out.shape == (B, S, D) and out.dtype == jnp.float32
    print("KERNEL_OK")
</pallas_src>

<mosaic_0001>
module attributes {stable_mosaic.version = 11 : i64} {
  func.func @msingi_block_kernel(%arg0: memref<16x32xf32, #tpu.memory_space<vmem>>, %arg1: memref<16x32xf32, #tpu.memory_space<vmem>>, %arg2: memref<16x32xf32, #tpu.memory_space<vmem>>, %arg3: memref<16x16xf32, #tpu.memory_space<vmem>>, %arg4: memref<1x32xf32, #tpu.memory_space<vmem>>, %arg5: memref<1x32xf32, #tpu.memory_space<vmem>>, %arg6: memref<1x32xf32, #tpu.memory_space<vmem>>, %arg7: memref<1x32xf32, #tpu.memory_space<vmem>>, %arg8: memref<32x160xf32, #tpu.memory_space<vmem>>, %arg9: memref<32x32xf32, #tpu.memory_space<vmem>>, %arg10: memref<32x128xf32, #tpu.memory_space<vmem>>, %arg11: memref<1x128xf32, #tpu.memory_space<vmem>>, %arg12: memref<128x32xf32, #tpu.memory_space<vmem>>, %arg13: memref<1x32xf32, #tpu.memory_space<vmem>>, %arg14: memref<16x32xf32, #tpu.memory_space<vmem>>) attributes {dimension_semantics = [], scalar_prefetch = 0 : i64, scratch_operands = 0 : i64, tpu.core_type = #tpu.core_type<tc>} {
    %c0 = arith.constant 0 : index
    %c0_0 = arith.constant 0 : index
    %0 = vector.load %arg0[%c0, %c0_0] : memref<16x32xf32, #tpu.memory_space<vmem>>, vector<16x32xf32>
    %cst = arith.constant dense<0.000000e+00> : vector<16xf32>
    %1 = vector.multi_reduction <add>, %0, %cst [1] : vector<16x32xf32> to vector<16xf32>
    %2 = vector.shape_cast %1 : vector<16xf32> to vector<16x1xf32>
    %cst_1 = arith.constant 3.200000e+01 : f32
    %3 = vector.broadcast %cst_1 : f32 to vector<16x1xf32>
    %4 = arith.divf %2, %3 : vector<16x1xf32>
    %5 = vector.broadcast %4 : vector<16x1xf32> to vector<16x32xf32>
    %6 = arith.subf %0, %5 : vector<16x32xf32>
    %7 = arith.mulf %6, %6 : vector<16x32xf32>
    %cst_2 = arith.constant dense<0.000000e+00> : vector<16xf32>
    %8 = vector.multi_reduction <add>, %7, %cst_2 [1] : vector<16x32xf32> to vector<16xf32>
    %9 = vector.shape_cast %8 : vector<16xf32> to vector<16x1xf32>
    %cst_3 = arith.constant 3.200000e+01 : f32
    %10 = vector.broadcast %cst_3 : f32 to vector<16x1xf32>
    %11 = arith.divf %9, %10 : vector<16x1xf32>
    %12 = vector.broadcast %4 : vector<16x1xf32> to vector<16x32xf32>
    %13 = arith.subf %0, %12 : vector<16x32xf32>
    %cst_4 = arith.constant 9.99999974E-6 : f32
    %14 = vector.broadcast %cst_4 : f32 to vector<16x1xf32>
    %15 = arith.addf %11, %14 : vector<16x1xf32>
    %16 = math.rsqrt %15 : vector<16x1xf32>
    %17 = vector.broadcast %16 : vector<16x1xf32> to vector<16x32xf32>
    %18 = arith.mulf %13, %17 : vector<16x32xf32>
    %c0_5 = arith.constant 0 : index
    %c0_6 = arith.constant 0 : index
    %19 = vector.load %arg4[%c0_5, %c0_6] : memref<1x32xf32, #tpu.memory_space<vmem>>, vector<1x32xf32>
    %20 = vector.broadcast %19 : vector<1x32xf32> to vector<16x32xf32>
    %21 = arith.mulf %18, %20 : vector<16x32xf32>
    %c0_7 = arith.constant 0 : index
    %c0_8 = arith.constant 0 : index
    %22 = vector.load %arg5[%c0_7, %c0_8] : memref<1x32xf32, #tpu.memory_space<vmem>>, vector<1x32xf32>
    %23 = vector.broadcast %22 : vector<1x32xf32> to vector<16x32xf32>
    %24 = arith.addf %21, %23 : vector<16x32xf32>
    %c0_9 = arith.constant 0 : index
    %c0_10 = arith.constant 0 : index
    %25 = vector.load %arg8[%c0_9, %c0_10] : memref<32x160xf32, #tpu.memory_space<vmem>>, vector<32x160xf32>
    %cst_11 = arith.constant dense<0.000000e+00> : vector<16x160xf32>
    %26 = tpu.matmul %24, %25, %cst_11 {dimension_numbers = #tpu.dot_dimension_numbers<[1], [0], [0], [1], [0, 0, 1, 1], [], []>} : vector<16x32xf32>, vector<32x160xf32>, vector<16x160xf32> -> vector<16x160xf32>
    %27 = vector.extract_strided_slice %26 {offsets = [0, 0], sizes = [16, 32], strides = [1, 1]} : vector<16x160xf32> to vector<16x32xf32>
    %28 = vector.extract_strided_slice %26 {offsets = [0, 32], sizes = [16, 32], strides = [1, 1]} : vector<16x160xf32> to vector<16x32xf32>
    %29 = vector.extract_strided_slice %26 {offsets = [0, 64], sizes = [16, 32], strides = [1, 1]} : vector<16x160xf32> to vector<16x32xf32>
    %30 = vector.extract_strided_slice %26 {offsets = [0, 96], sizes = [16, 32], strides = [1, 1]} : vector<16x160xf32> to vector<16x32xf32>
    %31 = vector.extract_strided_slice %26 {offsets = [0, 128], sizes = [16, 32], strides = [1, 1]} : vector<16x160xf32> to vector<16x32xf32>
    %c0_12 = arith.constant 0 : index
    %c0_13 = arith.constant 0 : index
    %32 = vector.load %arg1[%c0_12, %c0_13] : memref<16x32xf32, #tpu.memory_space<vmem>>, vector<16x32xf32>
    %c0_14 = arith.constant 0 : index
    %c0_15 = arith.constant 0 : index
    %33 = vector.load %arg2[%c0_14, %c0_15] : memref<16x32xf32, #tpu.memory_space<vmem>>, vector<16x32xf32>
    %34 = arith.mulf %27, %32 : vector<16x32xf32>
    %35 = arith.mulf %30, %33 : vector<16x32xf32>
    %36 = arith.addf %34, %35 : vector<16x32xf32>
    %37 = arith.mulf %28, %32 : vector<16x32xf32>
    %38 = arith.mulf %31, %33 : vector<16x32xf32>
    %39 = arith.addf %37, %38 : vector<16x32xf32>
    %c0_16 = arith.constant 0 : index
    %c0_17 = arith.constant 0 : index
    %40 = vector.load %arg3[%c0_16, %c0_17] : memref<16x16xf32, #tpu.memory_space<vmem>>, vector<16x16xf32>
    %c0_18 = arith.constant 0 : index
    %c0_19 = arith.constant 0 : index
    %41 = vector.load %arg9[%c0_18, %c0_19] : memref<32x32xf32, #tpu.memory_space<vmem>>, vector<32x32xf32>
    %42 = vector.extract_strided_slice %36 {offsets = [0, 0], sizes = [16, 8], strides = [1, 1]} : vector<16x32xf32> to vector<16x8xf32>
    %43 = vector.extract_strided_slice %39 {offsets = [0, 0], sizes = [16, 8], strides = [1, 1]} : vector<16x32xf32> to vector<16x8xf32>
    %44 = vector.extract_strided_slice %29 {offsets = [0, 0], sizes = [16, 8], strides = [1, 1]} : vector<16x32xf32> to vector<16x8xf32>
    %cst_20 = arith.constant dense<0.000000e+00> : vector<16x16xf32>
    %45 = tpu.matmul %42, %43, %cst_20 {dimension_numbers = #tpu.dot_dimension_numbers<[1], [1], [0], [0], [0, 0, 1, 0], [], []>} : vector<16x8xf32>, vector<16x8xf32>, vector<16x16xf32> -> vector<16x16xf32>
    %46 = arith.addf %45, %40 : vector<16x16xf32>
    %cst_21 = arith.constant dense<0xFF800000> : vector<16xf32>
    %47 = vector.multi_reduction <maximumf>, %46, %cst_21 [1] : vector<16x16xf32> to vector<16xf32>
    %48 = vector.shape_cast %47 : vector<16xf32> to vector<16x1xf32>
    %49 = vector.broadcast %48 : vector<16x1xf32> to vector<16x16xf32>
    %50 = arith.subf %46, %49 : vector<16x16xf32>
    %51 = math.exp %50 : vector<16x16xf32>
    %cst_22 = arith.constant dense<0.000000e+00> : vector<16xf32>
    %52 = vector.multi_reduction <add>, %51, %cst_22 [1] : vector<16x16xf32> to vector<16xf32>
    %53 = vector.shape_cast %52 : vector<16xf32> to vector<16x1xf32>
    %54 = vector.broadcast %53 : vector<16x1xf32> to vector<16x16xf32>
    %55 = arith.divf %51, %54 : vector<16x16xf32>
    %cst_23 = arith.constant dense<0.000000e+00> : vector<16x8xf32>
    %56 = tpu.matmul %55, %44, %cst_23 {dimension_numbers = #tpu.dot_dimension_numbers<[1], [0], [0], [1], [0, 0, 1, 1], [], []>} : vector<16x16xf32>, vector<16x8xf32>, vector<16x8xf32> -> vector<16x8xf32>
    %57 = vector.extract_strided_slice %41 {offsets = [0, 0], sizes = [8, 32], strides = [1, 1]} : vector<32x32xf32> to vector<8x32xf32>
    %cst_24 = arith.constant dense<0.000000e+00> : vector<16x32xf32>
    %58 = tpu.matmul %56, %57, %cst_24 {dimension_numbers = #tpu.dot_dimension_numbers<[1], [0], [0], [1], [0, 0, 1, 1], [], []>} : vector<16x8xf32>, vector<8x32xf32>, vector<16x32xf32> -> vector<16x32xf32>
    %59 = arith.addf %0, %58 : vector<16x32xf32>
    %60 = vector.extract_strided_slice %36 {offsets = [0, 8], sizes = [16, 8], strides = [1, 1]} : vector<16x32xf32> to vector<16x8xf32>
    %61 = vector.extract_strided_slice %39 {offsets = [0, 8], sizes = [16, 8], strides = [1, 1]} : vector<16x32xf32> to vector<16x8xf32>
    %62 = vector.extract_strided_slice %29 {offsets = [0, 8], sizes = [16, 8], strides = [1, 1]} : vector<16x32xf32> to vector<16x8xf32>
    %cst_25 = arith.constant dense<0.000000e+00> : vector<16x16xf32>
    %63 = tpu.matmul %60, %61, %cst_25 {dimension_numbers = #tpu.dot_dimension_numbers<[1], [1], [0], [0], [0, 0, 1, 0], [], []>} : vector<16x8xf32>, vector<16x8xf32>, vector<16x16xf32> -> vector<16x16xf32>
    %64 = arith.addf %63, %40 : vector<16x16xf32>
    %cst_26 = arith.constant dense<0xFF800000> : vector<16xf32>
    %65 = vector.multi_reduction <maximumf>, %64, %cst_26 [1] : vector<16x16xf32> to vector<16xf32>
    %66 = vector.shape_cast %65 : vector<16xf32> to vector<16x1xf32>
    %67 = vector.broadcast %66 : vector<16x1xf32> to vector<16x16xf32>
    %68 = arith.subf %64, %67 : vector<16x16xf32>
    %69 = math.exp %68 : vector<16x16xf32>
    %cst_27 = arith.constant dense<0.000000e+00> : vector<16xf32>
    %70 = vector.multi_reduction <add>, %69, %cst_27 [1] : vector<16x16xf32> to vector<16xf32>
    %71 = vector.shape_cast %70 : vector<16xf32> to vector<16x1xf32>
    %72 = vector.broadcast %71 : vector<16x1xf32> to vector<16x16xf32>
    %73 = arith.divf %69, %72 : vector<16x16xf32>
    %cst_28 = arith.constant dense<0.000000e+00> : vector<16x8xf32>
    %74 = tpu.matmul %73, %62, %cst_28 {dimension_numbers = #tpu.dot_dimension_numbers<[1], [0], [0], [1], [0, 0, 1, 1], [], []>} : vector<16x16xf32>, vector<16x8xf32>, vector<16x8xf32> -> vector<16x8xf32>
    %75 = vector.extract_strided_slice %41 {offsets = [8, 0], sizes = [8, 32], strides = [1, 1]} : vector<32x32xf32> to vector<8x32xf32>
    %cst_29 = arith.constant dense<0.000000e+00> : vector<16x32xf32>
    %76 = tpu.matmul %74, %75, %cst_29 {dimension_numbers = #tpu.dot_dimension_numbers<[1], [0], [0], [1], [0, 0, 1, 1], [], []>} : vector<16x8xf32>, vector<8x32xf32>, vector<16x32xf32> -> vector<16x32xf32>
    %77 = arith.addf %59, %76 : vector<16x32xf32>
    %78 = vector.extract_strided_slice %36 {offsets = [0, 16], sizes = [16, 8], strides = [1, 1]} : vector<16x32xf32> to vector<16x8xf32>
    %79 = vector.extract_strided_slice %39 {offsets = [0, 16], sizes = [16, 8], strides = [1, 1]} : vector<16x32xf32> to vector<16x8xf32>
    %80 = vector.extract_strided_slice %29 {offsets = [0, 16], sizes = [16, 8], strides = [1, 1]} : vector<16x32xf32> to vector<16x8xf32>
    %cst_30 = arith.constant dense<0.000000e+00> : vector<16x16xf32>
    %81 = tpu.matmul %78, %79, %cst_30 {dimension_numbers = #tpu.dot_dimension_numbers<[1], [1], [0], [0], [0, 0, 1, 0], [], []>} : vector<16x8xf32>, vector<16x8xf32>, vector<16x16xf32> -> vector<16x16xf32>
    %82 = arith.addf %81, %40 : vector<16x16xf32>
    %cst_31 = arith.constant dense<0xFF800000> : vector<16xf32>
    %83 = vector.multi_reduction <maximumf>, %82, %cst_31 [1] : vector<16x16xf32> to vector<16xf32>
    %84 = vector.shape_cast %83 : vector<16xf32> to vector<16x1xf32>
    %85 = vector.broadcast %84 : vector<16x1xf32> to vector<16x16xf32>
    %86 = arith.subf %82, %85 : vector<16x16xf32>
    %87 = math.exp %86 : vector<16x16xf32>
    %cst_32 = arith.constant dense<0.000000e+00> : vector<16xf32>
    %88 = vector.multi_reduction <add>, %87, %cst_32 [1] : vector<16x16xf32> to vector<16xf32>
    %89 = vector.shape_cast %88 : vector<16xf32> to vector<16x1xf32>
    %90 = vector.broadcast %89 : vector<16x1xf32> to vector<16x16xf32>
    %91 = arith.divf %87, %90 : vector<16x16xf32>
    %cst_33 = arith.constant dense<0.000000e+00> : vector<16x8xf32>
    %92 = tpu.matmul %91, %80, %cst_33 {dimension_numbers = #tpu.dot_dimension_numbers<[1], [0], [0], [1], [0, 0, 1, 1], [], []>} : vector<16x16xf32>, vector<16x8xf32>, vector<16x8xf32> -> vector<16x8xf32>
    %93 = vector.extract_strided_slice %41 {offsets = [16, 0], sizes = [8, 32], strides = [1, 1]} : vector<32x32xf32> to vector<8x32xf32>
    %cst_34 = arith.constant dense<0.000000e+00> : vector<16x32xf32>
    %94 = tpu.matmul %92, %93, %cst_34 {dimension_numbers = #tpu.dot_dimension_numbers<[1], [0], [0], [1], [0, 0, 1, 1], [], []>} : vector<16x8xf32>, vector<8x32xf32>, vector<16x32xf32> -> vector<16x32xf32>
    %95 = arith.addf %77, %94 : vector<16x32xf32>
    %96 = vector.extract_strided_slice %36 {offsets = [0, 24], sizes = [16, 8], strides = [1, 1]} : vector<16x32xf32> to vector<16x8xf32>
    %97 = vector.extract_strided_slice %39 {offsets = [0, 24], sizes = [16, 8], strides = [1, 1]} : vector<16x32xf32> to vector<16x8xf32>
    %98 = vector.extract_strided_slice %29 {offsets = [0, 24], sizes = [16, 8], strides = [1, 1]} : vector<16x32xf32> to vector<16x8xf32>
    %cst_35 = arith.constant dense<0.000000e+00> : vector<16x16xf32>
    %99 = tpu.matmul %96, %97, %cst_35 {dimension_numbers = #tpu.dot_dimension_numbers<[1], [1], [0], [0], [0, 0, 1, 0], [], []>} : vector<16x8xf32>, vector<16x8xf32>, vector<16x16xf32> -> vector<16x16xf32>
    %100 = arith.addf %99, %40 : vector<16x16xf32>
    %cst_36 = arith.constant dense<0xFF800000> : vector<16xf32>
    %101 = vector.multi_reduction <maximumf>, %100, %cst_36 [1] : vector<16x16xf32> to vector<16xf32>
    %102 = vector.shape_cast %101 : vector<16xf32> to vector<16x1xf32>
    %103 = vector.broadcast %102 : vector<16x1xf32> to vector<16x16xf32>
    %104 = arith.subf %100, %103 : vector<16x16xf32>
    %105 = math.exp %104 : vector<16x16xf32>
    %cst_37 = arith.constant dense<0.000000e+00> : vector<16xf32>
    %106 = vector.multi_reduction <add>, %105, %cst_37 [1] : vector<16x16xf32> to vector<16xf32>
    %107 = vector.shape_cast %106 : vector<16xf32> to vector<16x1xf32>
    %108 = vector.broadcast %107 : vector<16x1xf32> to vector<16x16xf32>
    %109 = arith.divf %105, %108 : vector<16x16xf32>
    %cst_38 = arith.constant dense<0.000000e+00> : vector<16x8xf32>
    %110 = tpu.matmul %109, %98, %cst_38 {dimension_numbers = #tpu.dot_dimension_numbers<[1], [0], [0], [1], [0, 0, 1, 1], [], []>} : vector<16x16xf32>, vector<16x8xf32>, vector<16x8xf32> -> vector<16x8xf32>
    %111 = vector.extract_strided_slice %41 {offsets = [24, 0], sizes = [8, 32], strides = [1, 1]} : vector<32x32xf32> to vector<8x32xf32>
    %cst_39 = arith.constant dense<0.000000e+00> : vector<16x32xf32>
    %112 = tpu.matmul %110, %111, %cst_39 {dimension_numbers = #tpu.dot_dimension_numbers<[1], [0], [0], [1], [0, 0, 1, 1], [], []>} : vector<16x8xf32>, vector<8x32xf32>, vector<16x32xf32> -> vector<16x32xf32>
    %113 = arith.addf %95, %112 : vector<16x32xf32>
    %cst_40 = arith.constant dense<0.000000e+00> : vector<16xf32>
    %114 = vector.multi_reduction <add>, %113, %cst_40 [1] : vector<16x32xf32> to vector<16xf32>
    %115 = vector.shape_cast %114 : vector<16xf32> to vector<16x1xf32>
    %cst_41 = arith.constant 3.200000e+01 : f32
    %116 = vector.broadcast %cst_41 : f32 to vector<16x1xf32>
    %117 = arith.divf %115, %116 : vector<16x1xf32>
    %118 = vector.broadcast %117 : vector<16x1xf32> to vector<16x32xf32>
    %119 = arith.subf %113, %118 : vector<16x32xf32>
    %120 = arith.mulf %119, %119 : vector<16x32xf32>
    %cst_42 = arith.constant dense<0.000000e+00> : vector<16xf32>
    %121 = vector.multi_reduction <add>, %120, %cst_42 [1] : vector<16x32xf32> to vector<16xf32>
    %122 = vector.shape_cast %121 : vector<16xf32> to vector<16x1xf32>
    %cst_43 = arith.constant 3.200000e+01 : f32
    %123 = vector.broadcast %cst_43 : f32 to vector<16x1xf32>
    %124 = arith.divf %122, %123 : vector<16x1xf32>
    %125 = vector.broadcast %117 : vector<16x1xf32> to vector<16x32xf32>
    %126 = arith.subf %113, %125 : vector<16x32xf32>
    %cst_44 = arith.constant 9.99999974E-6 : f32
    %127 = vector.broadcast %cst_44 : f32 to vector<16x1xf32>
    %128 = arith.addf %124, %127 : vector<16x1xf32>
    %129 = math.rsqrt %128 : vector<16x1xf32>
    %130 = vector.broadcast %129 : vector<16x1xf32> to vector<16x32xf32>
    %131 = arith.mulf %126, %130 : vector<16x32xf32>
    %c0_45 = arith.constant 0 : index
    %c0_46 = arith.constant 0 : index
    %132 = vector.load %arg6[%c0_45, %c0_46] : memref<1x32xf32, #tpu.memory_space<vmem>>, vector<1x32xf32>
    %133 = vector.broadcast %132 : vector<1x32xf32> to vector<16x32xf32>
    %134 = arith.mulf %131, %133 : vector<16x32xf32>
    %c0_47 = arith.constant 0 : index
    %c0_48 = arith.constant 0 : index
    %135 = vector.load %arg7[%c0_47, %c0_48] : memref<1x32xf32, #tpu.memory_space<vmem>>, vector<1x32xf32>
    %136 = vector.broadcast %135 : vector<1x32xf32> to vector<16x32xf32>
    %137 = arith.addf %134, %136 : vector<16x32xf32>
    %c0_49 = arith.constant 0 : index
    %c0_50 = arith.constant 0 : index
    %138 = vector.load %arg10[%c0_49, %c0_50] : memref<32x128xf32, #tpu.memory_space<vmem>>, vector<32x128xf32>
    %cst_51 = arith.constant dense<0.000000e+00> : vector<16x128xf32>
    %139 = tpu.matmul %137, %138, %cst_51 {dimension_numbers = #tpu.dot_dimension_numbers<[1], [0], [0], [1], [0, 0, 1, 1], [], []>} : vector<16x32xf32>, vector<32x128xf32>, vector<16x128xf32> -> vector<16x128xf32>
    %c0_52 = arith.constant 0 : index
    %c0_53 = arith.constant 0 : index
    %140 = vector.load %arg11[%c0_52, %c0_53] : memref<1x128xf32, #tpu.memory_space<vmem>>, vector<1x128xf32>
    %141 = vector.broadcast %140 : vector<1x128xf32> to vector<16x128xf32>
    %142 = arith.addf %139, %141 : vector<16x128xf32>
    %cst_54 = arith.constant 5.000000e-01 : f32
    %143 = vector.broadcast %cst_54 : f32 to vector<16x128xf32>
    %144 = arith.mulf %143, %142 : vector<16x128xf32>
    %cst_55 = arith.constant 4.471500e-02 : f32
    %145 = vector.broadcast %cst_55 : f32 to vector<16x128xf32>
    %146 = arith.mulf %145, %142 : vector<16x128xf32>
    %147 = arith.mulf %146, %142 : vector<16x128xf32>
    %148 = arith.mulf %147, %142 : vector<16x128xf32>
    %149 = arith.addf %142, %148 : vector<16x128xf32>
    %cst_56 = arith.constant 0.797884583 : f32
    %150 = vector.broadcast %cst_56 : f32 to vector<16x128xf32>
    %151 = arith.mulf %150, %149 : vector<16x128xf32>
    %152 = math.tanh %151 : vector<16x128xf32>
    %cst_57 = arith.constant 1.000000e+00 : f32
    %153 = vector.broadcast %cst_57 : f32 to vector<16x128xf32>
    %154 = arith.addf %153, %152 : vector<16x128xf32>
    %155 = arith.mulf %144, %154 : vector<16x128xf32>
    %c0_58 = arith.constant 0 : index
    %c0_59 = arith.constant 0 : index
    %156 = vector.load %arg12[%c0_58, %c0_59] : memref<128x32xf32, #tpu.memory_space<vmem>>, vector<128x32xf32>
    %cst_60 = arith.constant dense<0.000000e+00> : vector<16x32xf32>
    %157 = tpu.matmul %155, %156, %cst_60 {dimension_numbers = #tpu.dot_dimension_numbers<[1], [0], [0], [1], [0, 0, 1, 1], [], []>} : vector<16x128xf32>, vector<128x32xf32>, vector<16x32xf32> -> vector<16x32xf32>
    %c0_61 = arith.constant 0 : index
    %c0_62 = arith.constant 0 : index
    %158 = vector.load %arg13[%c0_61, %c0_62] : memref<1x32xf32, #tpu.memory_space<vmem>>, vector<1x32xf32>
    %159 = vector.broadcast %158 : vector<1x32xf32> to vector<16x32xf32>
    %160 = arith.addf %157, %159 : vector<16x32xf32>
    %161 = arith.addf %113, %160 : vector<16x32xf32>
    %c0_63 = arith.constant 0 : index
    %c0_64 = arith.constant 0 : index
    %162 = vector.load %arg14[%c0_63, %c0_64] : memref<16x32xf32, #tpu.memory_space<vmem>>, vector<16x32xf32>
    tpu.vector_store %arg14[%c0_63, %c0_64], %161 {strides = array<i32>} : memref<16x32xf32, #tpu.memory_space<vmem>>, vector<16x32xf32>,
    return
  }
}

</mosaic_0001>

<bundles_post_ra>
// kernel: msingi_block.1
= control target key start
LH: loop header
LB: loop body
LE: loop exit
PB: predicated region body
PF: predicated region fallthrough
CT: control target
= control target key end

     0   :  { %19 = vsyncpa [#allocation3], 0  ;;  %s2446_s0 = inlined_call_operand.vmem [shape: f32[16,32], index: 0, kind: input, shape index: {}]   ;;  %s2447_s1 = inlined_call_operand.vmem [shape: f32[16,32], index: 1, kind: input, shape index: {}]   ;;  %s2448_s2 = inlined_call_operand.hbm [shape: f32[16,32], index: 2, kind: input, shape index: {}]   ;;  %s2449_s3 = inlined_call_operand.hbm [shape: f32[16,16], index: 3, kind: input, shape index: {}]   ;;  %s2450_s4 = inlined_call_operand.vmem [shape: f32[1,32], index: 4, kind: input, shape index: {}]   ;;  %s2451_s5 = inlined_call_operand.vmem [shape: f32[1,32], index: 5, kind: input, shape index: {}]   ;;  %s2452_s6 = inlined_call_operand.vmem [shape: f32[1,32], index: 6, kind: input, shape index: {}]   ;;  %s2453_s7 = inlined_call_operand.vmem [shape: f32[1,32], index: 7, kind: input, shape index: {}]   ;;  %s2454_s8 = inlined_call_operand.vmem [shape: f32[32,160], index: 8, kind: input, shape index: {}]   ;;  %s2455_s9 = inlined_call_operand.vmem [shape: f32[32,32], index: 9, kind: input, shape index: {}]   ;;  %s2456_s10 = inlined_call_operand.vmem [shape: f32[32,128], index: 10, kind: input, shape index: {}]   ;;  %s2457_s11 = inlined_call_operand.vmem [shape: f32[1,128], index: 11, kind: input, shape index: {}]   ;;  %s2458_s12 = inlined_call_operand.vmem [shape: f32[128,32], index: 12, kind: input, shape index: {}]   ;;  %s2459_s13 = inlined_call_operand.vmem [shape: f32[1,32], index: 13, kind: input, shape index: {}]   ;;  %s2460_s14 = inlined_call_operand.hbm [shape: f32[16,32], index: 14, kind: output, shape index: {}]  }
   0x1   :  { %20 = vsyncpa [#allocation6], 0 }
   0x2   :  { %21 = vsyncpa [#allocation4], 0  ;;  %s2039_s29 = smov [#allocation2]  }
   0x3   :  { %s31_s30 = sshll.u32 %s2039_s29, 4  ;;  %s32_s30 = int_to_ptr.vmem [resolvable:$true] %s31_s30 }
   0x4   :  { %s1981_s15 = scalar_lea.vmem %s32_s30, 256  ;;  %p1986_p1 = scmp.lt.s32.totalorder %s32_s30, %s32_s30 }
   0x5   :  { %p1982_p0 = scmp.ne.s32.totalorder %s32_s30, %s1981_s15  ;;  %p1987_p2 = scmp.lt.s32.totalorder %s1981_s15, %s1981_s15 }
   0x7   :  { %p1988_p3 = por %p1987_p2, %p1986_p1 }
   0x9   :  { %p1989_p4 = pnand %p1988_p3, %p1982_p0 }
   0xb   :  { %1992 = shalt.err (!%p1989_p4)
}
   0xc   :  { %s2040_s16 = smov 128   ;;  %s2041_s17 = smov 8  }
   0xd   :  { %37 = dma.hbm_to_vmem [thread:$0]  %s2448_s2, 256, %s32_s30, [#allocation3], %s2040_s16, %s2040_s16, %s2041_s17  }
   0xe   :  { %s2042_s20 = smov [#allocation5]  }
   0xf   :  { %s43_s21 = sshll.u32 %s2042_s20, 4  ;;  %s44_s21 = int_to_ptr.vmem [resolvable:$true] %s43_s21 }
  0x10   :  { %s2001_s22 = scalar_lea.vmem %s44_s21, 256  ;;  %p2006_p6 = scmp.lt.s32.totalorder %s44_s21, %s44_s21 }
  0x11   :  { %p2002_p5 = scmp.ne.s32.totalorder %s44_s21, %s2001_s22  ;;  %p2007_p7 = scmp.lt.s32.totalorder %s2001_s22, %s2001_s22 }
  0x13   :  { %p2008_p8 = por %p2007_p7, %p2006_p6 }
  0x15   :  { %p2009_p9 = pnand %p2008_p8, %p2002_p5 }
  0x17   :  { %2012 = shalt.err (!%p2009_p9)
}
  0x18   :  { %49 = dma.hbm_to_vmem [thread:$0]  %s2449_s3, 256, %s44_s21, [#allocation6], %s2040_s16, %s2040_s16, %s2041_s17  }
  0x19   :  { %2033 = dma.done.wait [#allocation3], 256  }
  0x1a   :  { %2034 = vsyncadd [#allocation3], 4294967040 }
  0x1b   :  { %2035 = dma.done.wait [#allocation6], 256  }
  0x1c   :  { %2036 = vsyncadd [#allocation6], 4294967040  ;;  %vm78_vm0 = vcmask 261120   ;;  %v2147_v0 = vld [vmem:[%s2446_s0] sm:$0xff]  ;;  %v2152_v1 = vld [vmem:[%s2446_s0 + $0x8] sm:$0xff]  ;;  %v2043_v18 = vmov 0.0  }
  0x1d   :  { %v79_v2 = vsel %vm78_vm0, %v2147_v0, 0.0  ;;  %v82_v3 = vsel %vm78_vm0, %v2152_v1, 0.0  ;;  %v131_v14 = vld [vmem:[%s2454_s8 + $0x38] sm:$0xff]  ;;  %v130_v15 = vld [vmem:[%s2454_s8 + $0x30] sm:$0xff]  ;;  %v129_v16 = vld [vmem:[%s2454_s8 + $0x28] sm:$0xff]  ;;  %202 = vmatprep.mubr.f32.mxu1 %v2043_v18  ;;  %s2044_s29 = smov 32  }
  0x1e   :  { %80 = vadd.xlane.f32.xlu0 %v79_v2  ;;  %162 = vmatprep.subr.mxu1 %v131_v14  ;;  %v128_v17 = vld [vmem:[%s2454_s8 + $0x20] sm:$0xff]  ;;  %v127_v19 = vld [vmem:[%s2454_s8 + $0x18] sm:$0xff]  ;;  %v126_v20 = vld [vmem:[%s2454_s8 + $0x10] sm:$0xff]  ;;  %vm275_vm1 = vcmask 64512   ;;  %vm361_vm2 = vcmask 130048   ;;  %s2048_s19 = smov 120  }
  0x1f   :  { %163 = vmatpush1.msra.mxu1 %v130_v15  ;;  %v125_v21 = vld [vmem:[%s2454_s8 + $0x8] sm:$0xff]  ;;  %v124_v22 = vld [vmem:[%s2454_s8] sm:$0xff]  ;;  %s2045_s8 = smov 96   ;;  %s2049_s20 = smov 80  }
  0x20   :  { %164 = vmatprep.subr.mxu1 %v129_v16  ;;  %v2189_v23 = vld [vmem:[%s2447_s1 + $0x8] sm:$0xff]  ;;  %v215_v24 = vld [vmem:[%s2447_s1] sm:$0xff]  ;;  %s2050_s21 = smov 112   ;;  %s2051_s24 = smov 56  }
  0x21   :  { %165 = vmatpush1.msra.mxu1 %v128_v17  ;;  %v217_v25 = vld [vmem:[#allocation2] sm:$0xff]  ;;  %v218_v45 = vld [vmem:[#allocation2 + $0x8] sm:$0xff]  ;;  %s2052_s2 = smov 72   ;;  %s2053_s25 = smov 104  }
  0x22   :  { %83 = vadd.xlane.f32.xlu0 %v82_v3  ;;  %166 = vmatprep.subr.mxu1 %v127_v19  ;;  %v1679_v33 = vld [vmem:[%s2450_s4] ss:$0 sm:$0xff]  ;;  %s2046_s4 = smov 64   ;;  %s2054_s26 = smov 48  }
  0x23   :  { %167 = vmatpush1.msra.mxu1 %v126_v20  ;;  %v1680_v35 = vld [vmem:[%s2451_s5] ss:$0 sm:$0xff]  ;;  %s2047_s5 = smov 88   ;;  %s2056_s28 = smov [#allocation7]  }
  0x24   :  { %168 = vmatprep.subr.mxu1 %v125_v21 }
  0x25   :  { %169 = vmatpush1.msra.mxu1 %v124_v22 }
  0x38   :  { %245 = vrot.lane.b32.xlu0 %v2189_v23, %s2044_s29 }
  0x3c   :  { %223 = vrot.lane.b32.xlu0 %v217_v25, %s2045_s8 }
  0xa7   :  { %v81_v4 = vpop.xlane.xlu0 %80 }
  0xa8   :  { %v86_v5 = vmul.f32 0.03125, %v81_v4 }
  0xaa   :  { %v88_v6 = vsub.f32 %v2147_v0, %v86_v5 }
  0xab   :  { %v84_v7 = vpop.xlane.xlu0 %83 }
  0xac   :  { %v87_v8 = vmul.f32 0.03125, %v84_v7  ;;  %v90_v9 = vmul.f32 %v88_v6, %v88_v6  ;;  %v2242_v7 = vld [vmem:[#allocation5 + $0x8] sm:$0xff] }
  0xae   :  { %v89_v10 = vsub.f32 %v2152_v1, %v87_v8  ;;  %v92_v11 = vsel %vm78_vm0, %v90_v9, 0.0  ;;  %v2244_v9 = vld [vmem:[#allocation5] sm:$0xff] }
  0xaf   :  { %93 = vadd.xlane.f32.xlu1 %v92_v11  ;;  %v246_v49 = vpop.permute.xlu0 %245 }
  0xb0   :  { %v91_v12 = vmul.f32 %v89_v10, %v89_v10 }
  0xb2   :  { %v95_v13 = vsel %vm78_vm0, %v91_v12, 0.0 }
  0xb3   :  { %96 = vadd.xlane.f32.xlu1 %v95_v13  ;;  %v224_v54 = vpop.permute.xlu0 %223 }
  0xc4   :  { %243 = vrot.lane.b32.xlu1 %v215_v24, %s2044_s29 }
 0x138   :  { %v94_v26 = vpop.xlane.xlu1 %93 }
 0x139   :  { %v98_v27 = vmul.f32 0.03125, %v94_v26 }
 0x13b   :  { %v100_v28 = vadd.f32 1e-05, %v98_v27 }
 0x13c   :  { %v97_v29 = vpop.xlane.xlu1 %96 }
 0x13d   :  { %1929 = vrsqrt.f32 %v100_v28  ;;  %v99_v30 = vmul.f32 0.03125, %v97_v29  ;;  %v265_v29 = vld [vmem:[%s2455_s9] sm:$0xff] }
 0x13f   :  { %v101_v31 = vadd.f32 1e-05, %v99_v30 }
 0x140   :  { %v244_v50 = vpop.permute.xlu1 %243 }
 0x141   :  { %1931 = vrsqrt.f32 %v101_v31 }
 0x14a   :  { %v1930_v32 = vpop.eup %1929 }
 0x14b   :  { %v104_v34 = vmul.f32 %v1930_v32, %v88_v6 }
 0x14d   :  { %v113_v36 = vmul.f32 %v1679_v33, %v104_v34 }
 0x14e   :  { %v1932_v37 = vpop.eup %1931 }
 0x14f   :  { %v122_v38 = vadd.f32 %v1680_v35, %v113_v36  ;;  %v105_v39 = vmul.f32 %v1932_v37, %v89_v10 }
 0x151   :  { %1681 = vmatmul.mubr.msk.f32.vlgmr.msra.gmra.mxu1 %vm78_vm0, %v122_v38  ;;  %v114_v40 = vmul.f32 %v1679_v33, %v105_v39 }
 0x152   :  { %208 = vmatprep.mubr.f32.mxu1 %v2043_v18 }
 0x153   :  { %v123_v41 = vadd.f32 %v1680_v35, %v114_v40 }
 0x155   :  { %1682 = vmatmul.mubr.msk.f32.gmra.mxu1 %vm78_vm0, %v123_v41 }
 0x211   :  { %v2206_v42 = vpop.f32.mrf.mxu1 }
 0x212   :  { %v249_v55 = vmul.f32 %v244_v50, %v2206_v42  ;;  %v229_v57 = vmul.f32 %v224_v54, %v2206_v42  ;;  %v219_v62 = vmul.f32 %v215_v24, %v2206_v42 }
 0x213   :  { %v206_v43 = vpop.f32.mrf.mxu1 }
 0x214   :  { %v251_v48 = vmul.f32 %v217_v25, %v206_v43 }
 0x215   :  { %v2208_v44 = vpop.f32.mrf.mxu1 }
 0x216   :  { %v250_v51 = vmul.f32 %v246_v49, %v2208_v44  ;;  %v220_v4 = vmul.f32 %v2189_v23, %v2208_v44 }
 0x217   :  { %v212_v46 = vpop.f32.mrf.mxu1 }
 0x218   :  { %v252_v47 = vmul.f32 %v218_v45, %v212_v46 }
 0x21a   :  { %257 = vrot.lane.b32.xlu1 %v252_v47, %s2044_s29 }
 0x21e   :  { %255 = vrot.lane.b32.xlu1 %v251_v48, %s2044_s29 }
 0x222   :  { %225 = vrot.lane.b32.xlu1 %v218_v45, %s2045_s8 }
 0x28c   :  { %v258_v52 = vpop.permute.xlu1 %257 }
 0x28d   :  { %v2214_v53 = vadd.f32 %v258_v52, %v250_v51 }
 0x28f   :  { %273 = vrot.lane.b32.xlu0 %v2214_v53, %s2045_s8 }
 0x290   :  { %v256_v56 = vpop.permute.xlu1 %255 }
 0x291   :  { %v2220_v58 = vadd.f32 %v256_v56, %v249_v55 }
 0x293   :  { %271 = vrot.lane.b32.xlu1 %v2220_v58, %s2045_s8  ;;  %233 = vrot.lane.b32.xlu0 %v229_v57, %s2044_s29 }
 0x294   :  { %v226_v59 = vpop.permute.xlu1 %225 }
 0x295   :  { %v230_v60 = vmul.f32 %v226_v59, %v2208_v44 }
 0x297   :  { %235 = vrot.lane.b32.xlu1 %v230_v60, %s2044_s29  ;;  %s2055_s29 = smov 40  }
 0x301   :  { %v274_v61 = vpop.permute.xlu0 %273 }
 0x302   :  { %1789 = vmatprep.subr.msk.mxu1 %vm275_vm1, %v274_v61 }
 0x303   :  { %1790 = vmatpush3.xpose.msk.msra.mxu1 %vm275_vm1, %v274_v61 }
 0x305   :  { %v272_v63 = vpop.permute.xlu1 %271  ;;  %v234_v2 = vpop.permute.xlu0 %233 }
 0x306   :  { %v2230_v3 = vadd.f32 %v234_v2, %v219_v62  ;;  %1791 = vmatprep.subr.msk.mxu1 %vm275_vm1, %v272_v63 }
 0x307   :  { %1792 = vmatpush3.xpose.msk.msra.mxu1 %vm275_vm1, %v272_v63 }
 0x308   :  { %1793 = vmatprep.mubr.msk.f32.mxu1 %vm275_vm1, %v2230_v3 }
 0x309   :  { %v236_v5 = vpop.permute.xlu1 %235 }
 0x30a   :  { %v2238_v6 = vadd.f32 %v236_v5, %v220_v4 }
 0x30c   :  { %1794 = vmatmul.mubr.msk.f32.vlgmr.msra.gmra.mxu1 %vm275_vm1, %v2238_v6 }
 0x3cc   :  { %v1795_v8 = vpop.f32.mrf.mxu1 }
 0x3cd   :  { %v358_v10 = vadd.f32 %v1795_v8, %v2242_v7 }
 0x3ce   :  { %v352_v11 = vpop.f32.mrf.mxu1 }
 0x3cf   :  { %v353_v12 = vadd.f32 %v352_v11, %v2244_v9  ;;  %v365_v13 = vsel %vm361_vm2, %v358_v10, -inf }
 0x3d0   :  { %366 = vmax.xlane.f32.xlu1 %v365_v13 }
 0x3d1   :  { %v362_v14 = vsel %vm361_vm2, %v353_v12, -inf }
 0x3d2   :  { %363 = vmax.xlane.f32.xlu0 %v362_v14 }
 0x3e1   :  { %386 = vrot.lane.b32.xlu1 %v2206_v42, %s2046_s4 }
 0x3e5   :  { %562 = vrot.lane.b32.xlu1 %v2214_v53, %s2047_s5 }
 0x3e9   :  { %560 = vrot.lane.b32.xlu1 %v2220_v58, %s2047_s5 }
 0x3ed   :  { %558 = vrot.lane.b32.xlu1 %v2238_v6, %s2048_s19 }
 0x3f1   :  { %843 = vrot.lane.b32.xlu1 %v2220_v58, %s2049_s20 }
 0x3f5   :  { %841 = vrot.lane.b32.xlu1 %v2238_v6, %s2050_s21 }
 0x459   :  { %v367_v15 = vpop.xlane.xlu1 %366 }
 0x45a   :  { %v369_v16 = vsub.f32 %v358_v10, %v367_v15 }
 0x45b   :  { %v364_v17 = vpop.xlane.xlu0 %363 }
 0x45c   :  { %v372_v18 = vmul.f32 1.442695, %v369_v16  ;;  %v368_v19 = vsub.f32 %v353_v12, %v364_v17 }
 0x45d   :  { %v387_v28 = vpop.permute.xlu1 %386 }
 0x45e   :  { %1933 = vpow2.f32 %v372_v18  ;;  %v370_v20 = vmul.f32 1.442695, %v368_v19 }
 0x460   :  { %1935 = vpow2.f32 %v370_v20 }
 0x461   :  { %v563_v34 = vpop.permute.xlu1 %562 }
 0x465   :  { %v561_v37 = vpop.permute.xlu1 %560 }
 0x469   :  { %v559_v40 = vpop.permute.xlu1 %558 }
 0x46b   :  { %v1934_v21 = vpop.eup %1933 }
 0x46c   :  { %v377_v22 = vsel %vm361_vm2, %v1934_v21, 0.0 }
 0x46d   :  { %v1936_v23 = vpop.eup %1935  ;;  %378 = vadd.xlane.f32.xlu0 %v377_v22  ;;  %v844_v43 = vpop.permute.xlu1 %843 }
 0x46e   :  { %v374_v24 = vsel %vm361_vm2, %v1936_v23, 0.0 }
 0x471   :  { %375 = vadd.xlane.f32.xlu0 %v374_v24  ;;  %v842_v45 = vpop.permute.xlu1 %841 }
 0x487   :  { %388 = vrot.lane.b32.xlu0 %v2208_v44, %s2046_s4 }
 0x48b   :  { %556 = vrot.lane.b32.xlu0 %v2230_v3, %s2048_s19 }
 0x48f   :  { %845 = vrot.lane.b32.xlu0 %v2214_v53, %s2049_s20 }
 0x493   :  { %839 = vrot.lane.b32.xlu0 %v2230_v3, %s2050_s21 }
 0x4f6   :  { %v379_v25 = vpop.xlane.xlu0 %378 }
 0x4f7   :  { %1937 = vrcp.f32 %v379_v25 }
 0x4fa   :  { %v376_v26 = vpop.xlane.xlu0 %375 }
 0x4fb   :  { %1939 = vrcp.f32 %v376_v26 }
 0x4fe   :  { %v389_v27 = vpop.permute.xlu0 %388 }
 0x4ff   :  { %1796 = vmatprep.subr.mxu1 %v389_v27 }
 0x500   :  { %1797 = vmatpush3.msra.mxu1 %v389_v27 }
 0x501   :  { %1798 = vmatprep.subr.mxu1 %v387_v28 }
 0x502   :  { %1799 = vmatpush3.msra.mxu1 %v387_v28  ;;  %v557_v35 = vpop.permute.xlu0 %556 }
 0x503   :  { %1803 = vmatprep.subr.mxu1 %v265_v29 }
 0x504   :  { %v1938_v30 = vpop.eup %1937 }
 0x505   :  { %v383_v33 = vmul.f32 %v1938_v30, %v1934_v21 }
 0x506   :  { %v846_v39 = vpop.permute.xlu0 %845 }
 0x508   :  { %v1940_v31 = vpop.eup %1939 }
 0x509   :  { %v381_v32 = vmul.f32 %v1940_v31, %v1936_v23 }
 0x50a   :  { %v840_v41 = vpop.permute.xlu0 %839 }
 0x50b   :  { %1800 = vmatprep.mubr.msk.f32.mxu1 %vm361_vm2, %v381_v32  ;;  %v266_v32 = vld [vmem:[%s2455_s9 + $0x8] sm:$0xff] }
 0x50c   :  { %1801 = vmatmul.mubr.msk.f32.vlgmr.msra.gmra.mxu1 %vm361_vm2, %v383_v33 }
 0x50d   :  { %1804 = vmatpush3.msra.mxu1 %v265_v29 }
 0x50e   :  { %1808 = vmatprep.subr.msk.mxu1 %vm275_vm1, %v563_v34 }
 0x5cc   :  { %v1802_v36 = vpop.f32.mrf.mxu1 }
 0x5ce   :  { %v464_v38 = vpop.f32.mrf.mxu1 }
 0x5cf   :  { %1805 = vmatprep.mubr.msk.f32.mxu1 %vm275_vm1, %v464_v38 }
 0x5d0   :  { %1806 = vmatmul.mubr.msk.f32.vlgmr.msra.gmra.mxu1 %vm275_vm1, %v1802_v36 }
 0x5d1   :  { %1809 = vmatpush3.xpose.msk.msra.mxu1 %vm275_vm1, %v563_v34  ;;  %1812 = vmatprep.mubr.msk.f32.mxu1 %vm275_vm1, %v557_v35 }
 0x5d2   :  { %1810 = vmatprep.subr.msk.mxu1 %vm275_vm1, %v561_v37 }
 0x5d5   :  { %1811 = vmatpush3.xpose.msk.msra.mxu1 %vm275_vm1, %v561_v37 }
 0x5d6   :  { %1827 = vmatprep.subr.msk.mxu1 %vm275_vm1, %v846_v39 }
 0x5d8   :  { %1813 = vmatmul.mubr.msk.f32.vlgmr.msra.gmra.mxu1 %vm275_vm1, %v559_v40 }
 0x5d9   :  { %1828 = vmatpush3.xpose.msk.msra.mxu1 %vm275_vm1, %v846_v39  ;;  %1831 = vmatprep.mubr.msk.f32.mxu1 %vm275_vm1, %v840_v41 }
 0x5da   :  { %1829 = vmatprep.subr.msk.mxu1 %vm275_vm1, %v844_v43 }
 0x5dd   :  { %1830 = vmatpush3.xpose.msk.msra.mxu1 %vm275_vm1, %v844_v43 }
 0x5e0   :  { %1832 = vmatmul.mubr.msk.f32.vlgmr.msra.gmra.mxu1 %vm275_vm1, %v842_v45 }
 0x690   :  { %v2281_v46 = vpop.f32.mrf.mxu1 }
 0x692   :  { %v2283_v47 = vpop.f32.mrf.mxu1 }
 0x698   :  { %v1814_v48 = vpop.f32.mrf.mxu1 }
 0x699   :  { %v644_v49 = vadd.f32 %v1814_v48, %v2242_v7 }
 0x69a   :  { %v638_v50 = vpop.f32.mrf.mxu1 }
 0x69b   :  { %v639_v51 = vadd.f32 %v638_v50, %v2244_v9  ;;  %v650_v52 = vsel %vm361_vm2, %v644_v49, -inf }
 0x69c   :  { %651 = vmax.xlane.f32.xlu1 %v650_v52 }
 0x69d   :  { %v647_v54 = vsel %vm361_vm2, %v639_v51, -inf }
 0x69e   :  { %648 = vmax.xlane.f32.xlu0 %v647_v54 }
 0x6a0   :  { %v1833_v55 = vpop.f32.mrf.mxu1 }
 0x6a1   :  { %v927_v56 = vadd.f32 %v1833_v55, %v2242_v7 }
 0x6a2   :  { %v921_v15 = vpop.f32.mrf.mxu1 }
 0x6a3   :  { %v933_v57 = vsel %vm361_vm2, %v927_v56, -inf  ;;  %v922_v16 = vadd.f32 %v921_v15, %v2244_v9 }
 0x6a5   :  { %v930_v17 = vsel %vm361_vm2, %v922_v16, -inf }
 0x6ad   :  { %669 = vrot.lane.b32.xlu1 %v2206_v42, %s2051_s24 }
 0x6b1   :  { %1128 = vrot.lane.b32.xlu1 %v2214_v53, %s2052_s2 }
 0x6b5   :  { %1126 = vrot.lane.b32.xlu1 %v2220_v58, %s2052_s2 }
 0x6b9   :  { %1124 = vrot.lane.b32.xlu1 %v2238_v6, %s2053_s25 }
 0x6dd   :  { %934 = vmax.xlane.f32.xlu1 %v933_v57 }
 0x6ee   :  { %952 = vrot.lane.b32.xlu1 %v2206_v42, %s2054_s26 }
 0x725   :  { %v652_v59 = vpop.xlane.xlu1 %651 }
 0x726   :  { %v654_v60 = vsub.f32 %v644_v49, %v652_v59 }
 0x727   :  { %v649_v61 = vpop.xlane.xlu0 %648 }
 0x728   :  { %v657_v53 = vmul.f32 1.442695, %v654_v60  ;;  %v653_v62 = vsub.f32 %v639_v51, %v649_v61  ;;  %v267_v51 = vld [vmem:[%s2455_s9 + $0x10] sm:$0xff] }
 0x729   :  { %v670_v58 = vpop.permute.xlu1 %669 }
 0x72a   :  { %1941 = vpow2.f32 %v657_v53  ;;  %v655_v63 = vmul.f32 1.442695, %v653_v62 }
 0x72c   :  { %1943 = vpow2.f32 %v655_v63 }
 0x72d   :  { %v1129_v2 = vpop.permute.xlu1 %1128 }
 0x72e   :  { %1846 = vmatprep.subr.msk.mxu1 %vm275_vm1, %v1129_v2 }
 0x72f   :  { %1847 = vmatpush3.xpose.msk.msra.mxu1 %vm275_vm1, %v1129_v2  ;;  %v554_v2 = vadd.f32 %v2283_v47, %v2147_v0  ;;  %v268_v0 = vld [vmem:[%s2455_s9 + $0x18] sm:$0xff] }
 0x731   :  { %v1127_v4 = vpop.permute.xlu1 %1126 }
 0x732   :  { %1848 = vmatprep.subr.msk.mxu1 %vm275_vm1, %v1127_v4 }
 0x733   :  { %1849 = vmatpush3.xpose.msk.msra.mxu1 %vm275_vm1, %v1127_v4 }
 0x735   :  { %v1125_v11 = vpop.permute.xlu1 %1124 }
 0x737   :  { %v1942_v5 = vpop.eup %1941 }
 0x738   :  { %v662_v6 = vsel %vm361_vm2, %v1942_v5, 0.0 }
 0x739   :  { %v1944_v8 = vpop.eup %1943  ;;  %663 = vadd.xlane.f32.xlu0 %v662_v6 }
 0x73a   :  { %v659_v10 = vsel %vm361_vm2, %v1944_v8, 0.0 }
 0x73d   :  { %660 = vadd.xlane.f32.xlu0 %v659_v10 }
 0x753   :  { %671 = vrot.lane.b32.xlu0 %v2208_v44, %s2051_s24 }
 0x757   :  { %1122 = vrot.lane.b32.xlu0 %v2230_v3, %s2053_s25 }
 0x766   :  { %v935_v12 = vpop.xlane.xlu1 %934 }
 0x767   :  { %v937_v13 = vsub.f32 %v927_v56, %v935_v12 }
 0x769   :  { %v940_v14 = vmul.f32 1.442695, %v937_v13 }
 0x76a   :  { %v953_v45 = vpop.permute.xlu1 %952 }
 0x76b   :  { %1945 = vpow2.f32 %v940_v14 }
 0x776   :  { %931 = vmax.xlane.f32.xlu0 %v930_v17 }
 0x778   :  { %v1946_v18 = vpop.eup %1945 }
 0x779   :  { %v945_v19 = vsel %vm361_vm2, %v1946_v18, 0.0 }
 0x77a   :  { %946 = vadd.xlane.f32.xlu0 %v945_v19 }
 0x7c2   :  { %v664_v20 = vpop.xlane.xlu0 %663 }
 0x7c3   :  { %1947 = vrcp.f32 %v664_v20 }
 0x7c6   :  { %v661_v21 = vpop.xlane.xlu0 %660 }
 0x7c7   :  { %1949 = vrcp.f32 %v661_v21 }
 0x7ca   :  { %v672_v3 = vpop.permute.xlu0 %671 }
 0x7cb   :  { %1815 = vmatprep.subr.mxu0 %v672_v3 }
 0x7cc   :  { %1816 = vmatpush3.msra.mxu0 %v672_v3 }
 0x7cd   :  { %1817 = vmatprep.subr.mxu0 %v670_v58 }
 0x7ce   :  { %1818 = vmatpush3.msra.mxu0 %v670_v58  ;;  %v1123_v22 = vpop.permute.xlu0 %1122  ;;  %v555_v58 = vadd.f32 %v2281_v46, %v2152_v1 }
 0x7cf   :  { %1850 = vmatprep.mubr.msk.f32.mxu1 %vm275_vm1, %v1123_v22  ;;  %1822 = vmatprep.subr.mxu0 %v266_v32 }
 0x7d0   :  { %1851 = vmatmul.mubr.msk.f32.vlgmr.msra.gmra.mxu1 %vm275_vm1, %v1125_v11  ;;  %v1948_v23 = vpop.eup %1947 }
 0x7d1   :  { %v668_v26 = vmul.f32 %v1948_v23, %v1942_v5 }
 0x7d4   :  { %v1950_v24 = vpop.eup %1949 }
 0x7d5   :  { %v666_v25 = vmul.f32 %v1950_v24, %v1944_v8 }
 0x7d7   :  { %1819 = vmatprep.mubr.msk.f32.mxu0 %vm361_vm2, %v666_v25 }
 0x7d8   :  { %1820 = vmatmul.mubr.msk.f32.vlgmr.msra.gmra.mxu0 %vm361_vm2, %v668_v26 }
 0x7d9   :  { %1823 = vmatpush3.msra.mxu0 %v266_v32 }
 0x7ff   :  { %v932_v27 = vpop.xlane.xlu0 %931 }
 0x800   :  { %v936_v28 = vsub.f32 %v922_v16, %v932_v27 }
 0x802   :  { %v938_v29 = vmul.f32 1.442695, %v936_v28 }
 0x803   :  { %v947_v39 = vpop.xlane.xlu0 %946 }
 0x804   :  { %1951 = vpow2.f32 %v938_v29 }
 0x805   :  { %1953 = vrcp.f32 %v947_v39 }
 0x811   :  { %v1952_v30 = vpop.eup %1951 }
 0x812   :  { %v942_v31 = vsel %vm361_vm2, %v1952_v30, 0.0 }
 0x813   :  { %943 = vadd.xlane.f32.xlu0 %v942_v31 }
 0x829   :  { %954 = vrot.lane.b32.xlu0 %v2208_v44, %s2054_s26 }
 0x890   :  { %v1852_v33 = vpop.f32.mrf.mxu1 }
 0x891   :  { %v1210_v34 = vadd.f32 %v1852_v33, %v2242_v7 }
 0x892   :  { %v1204_v35 = vpop.f32.mrf.mxu1 }
 0x893   :  { %v1205_v36 = vadd.f32 %v1204_v35, %v2244_v9  ;;  %v1216_v37 = vsel %vm361_vm2, %v1210_v34, -inf  ;;  %v1954_v9 = vpop.eup %1953  ;;  %v1452_v35 = vld [vmem:[%s2456_s10 + $0x18] sm:$0xff] }
 0x894   :  { %1217 = vmax.xlane.f32.xlu0 %v1216_v37  ;;  %v951_v50 = vmul.f32 %v1954_v9, %v1946_v18  ;;  %1865 = vmatprep.subr.mxu1 %v1452_v35  ;;  %v1450_v37 = vld [vmem:[%s2456_s10 + $0x8] sm:$0xff] }
 0x895   :  { %v1213_v38 = vsel %vm361_vm2, %v1205_v36, -inf  ;;  %1866 = vmatpush3.msra.mxu1 %v1452_v35 }
 0x896   :  { %1214 = vmax.xlane.f32.xlu1 %v1213_v38  ;;  %v1449_v38 = vld [vmem:[%s2456_s10] sm:$0xff] }
 0x898   :  { %v1821_v40 = vpop.f32.mrf.mxu0 }
 0x89a   :  { %v747_v41 = vpop.f32.mrf.mxu0 }
 0x89b   :  { %1824 = vmatprep.mubr.msk.f32.mxu0 %vm275_vm1, %v747_v41 }
 0x89c   :  { %1825 = vmatmul.mubr.msk.f32.vlgmr.msra.gmra.mxu0 %vm275_vm1, %v1821_v40  ;;  %v944_v43 = vpop.xlane.xlu0 %943 }
 0x89d   :  { %1955 = vrcp.f32 %v944_v43 }
 0x8a0   :  { %v955_v7 = vpop.permute.xlu0 %954 }
 0x8a1   :  { %1834 = vmatprep.subr.mxu0 %v955_v7 }
 0x8a2   :  { %1835 = vmatpush3.msra.mxu0 %v955_v7 }
 0x8a3   :  { %1836 = vmatprep.subr.mxu0 %v953_v45 }
 0x8a4   :  { %1837 = vmatpush3.msra.mxu0 %v953_v45 }
 0x8a5   :  { %1841 = vmatprep.subr.mxu0 %v267_v51 }
 0x8aa   :  { %v1956_v48 = vpop.eup %1955 }
 0x8ab   :  { %v949_v49 = vmul.f32 %v1956_v48, %v1952_v30 }
 0x8ad   :  { %1838 = vmatprep.mubr.msk.f32.mxu0 %vm361_vm2, %v949_v49  ;;  %v1715_v49 = vld [vmem:[%s2452_s6] ss:$0 sm:$0xff] }
 0x8ae   :  { %1839 = vmatmul.mubr.msk.f32.vlgmr.msra.gmra.mxu0 %vm361_vm2, %v951_v50 }
 0x8af   :  { %1842 = vmatpush3.msra.mxu0 %v267_v51 }
 0x91d   :  { %v1218_v52 = vpop.xlane.xlu0 %1217 }
 0x91e   :  { %v1220_v54 = vsub.f32 %v1210_v34, %v1218_v52 }
 0x91f   :  { %v1215_v55 = vpop.xlane.xlu1 %1214 }
 0x920   :  { %v1223_v56 = vmul.f32 1.442695, %v1220_v54  ;;  %v1219_v57 = vsub.f32 %v1205_v36, %v1215_v55  ;;  %v1451_v36 = vld [vmem:[%s2456_s10 + $0x10] sm:$0xff]  ;;  %v1716_v55 = vld [vmem:[%s2453_s7] ss:$0 sm:$0xff] }
 0x921   :  { %1867 = vmatprep.subr.mxu1 %v1451_v36 }
 0x922   :  { %1957 = vpow2.f32 %v1223_v56  ;;  %v1221_v59 = vmul.f32 1.442695, %v1219_v57  ;;  %1868 = vmatpush3.msra.mxu1 %v1451_v36 }
 0x923   :  { %1869 = vmatprep.subr.mxu1 %v1450_v37 }
 0x924   :  { %1959 = vpow2.f32 %v1221_v59  ;;  %1870 = vmatpush3.msra.mxu1 %v1450_v37  ;;  %v1574_v59 = vld [vmem:[%s2458_s12 + $0x78] sm:$0xff] }
 0x925   :  { %1871 = vmatprep.subr.mxu1 %v1449_v38 }
 0x926   :  { %1872 = vmatpush3.msra.mxu1 %v1449_v38 }
 0x92f   :  { %v1958_v60 = vpop.eup %1957 }
 0x930   :  { %v1228_v61 = vsel %vm361_vm2, %v1958_v60, 0.0 }
 0x931   :  { %v1960_v53 = vpop.eup %1959  ;;  %1229 = vadd.xlane.f32.xlu1 %v1228_v61  ;;  %v1572_v61 = vld [vmem:[%s2458_s12 + $0x68] sm:$0xff] }
 0x932   :  { %v1225_v62 = vsel %vm361_vm2, %v1960_v53, 0.0 }
 0x933   :  { %1226 = vadd.xlane.f32.xlu0 %v1225_v62  ;;  %v1570_v62 = vld [vmem:[%s2458_s12 + $0x58] sm:$0xff] }
 0x942   :  { %1235 = vrot.lane.b32.xlu1 %v2206_v42, %s2055_s29 }
 0x949   :  { %1237 = vrot.lane.b32.xlu0 %v2208_v44, %s2055_s29  ;;  %s1666_s29 = sshll.u32 %s2056_s28, 4  ;;  %s1667_s29 = int_to_ptr.vmem [resolvable:$true] %s1666_s29 }
 0x94a   :  { %s2013_s8 = scalar_lea.vmem %s1667_s29, 256  ;;  %p2018_p11 = scmp.lt.s32.totalorder %s1667_s29, %s1667_s29 }
 0x94b   :  { %p2014_p10 = scmp.ne.s32.totalorder %s1667_s29, %s2013_s8  ;;  %p2019_p12 = scmp.lt.s32.totalorder %s2013_s8, %s2013_s8 }
 0x94d   :  { %p2020_p13 = por %p2019_p12, %p2018_p11 }
 0x94f   :  { %p2021_p0 = pnand %p2020_p13, %p2014_p10 }
 0x95c   :  { %v1826_v63 = vpop.f32.mrf.mxu0 }
 0x95d   :  { %v838_v4 = vadd.f32 %v1826_v63, %v555_v58  ;;  %v1569_v58 = vld [vmem:[%s2458_s12 + $0x50] sm:$0xff]  ;;  %v1568_v63 = vld [vmem:[%s2458_s12 + $0x48] sm:$0xff] }
 0x95e   :  { %v828_v5 = vpop.f32.mrf.mxu0 }
 0x95f   :  { %v837_v6 = vadd.f32 %v828_v5, %v554_v2  ;;  %v1567_v2 = vld [vmem:[%s2458_s12 + $0x40] sm:$0xff]  ;;  %v1565_v5 = vld [vmem:[%s2458_s12 + $0x30] sm:$0xff] }
 0x96e   :  { %v1840_v8 = vpop.f32.mrf.mxu0 }
 0x970   :  { %v1030_v10 = vpop.f32.mrf.mxu0 }
 0x971   :  { %1843 = vmatprep.mubr.msk.f32.mxu0 %vm275_vm1, %v1030_v10  ;;  %v1562_v10 = vld [vmem:[%s2458_s12 + $0x18] sm:$0xff] }
 0x972   :  { %1844 = vmatmul.mubr.msk.f32.vlgmr.msra.gmra.mxu0 %vm275_vm1, %v1840_v8  ;;  %v1563_v8 = vld [vmem:[%s2458_s12 + $0x20] sm:$0xff] }
 0x9ba   :  { %v1230_v11 = vpop.xlane.xlu1 %1229 }
 0x9bb   :  { %1961 = vrcp.f32 %v1230_v11  ;;  %v1561_v11 = vld [vmem:[%s2458_s12 + $0x10] sm:$0xff] }
 0x9bc   :  { %v1227_v42 = vpop.xlane.xlu0 %1226 }
 0x9bd   :  { %1963 = vrcp.f32 %v1227_v42  ;;  %v1560_v42 = vld [vmem:[%s2458_s12 + $0x8] sm:$0xff] }
 0x9be   :  { %v1236_v1 = vpop.permute.xlu1 %1235 }
 0x9c0   :  { %v1238_v44 = vpop.permute.xlu0 %1237 }
 0x9c1   :  { %1853 = vmatprep.subr.mxu0 %v1238_v44 }
 0x9c2   :  { %1854 = vmatpush3.msra.mxu0 %v1238_v44  ;;  %v1559_v44 = vld [vmem:[%s2458_s12] sm:$0xff] }
 0x9c3   :  { %1855 = vmatprep.subr.mxu0 %v1236_v1 }
 0x9c4   :  { %1856 = vmatpush3.msra.mxu0 %v1236_v1  ;;  %v1717_v1 = vld [vmem:[%s2457_s11] ss:$0 sm:$0xff] }
 0x9c5   :  { %1860 = vmatprep.subr.mxu0 %v268_v0 }
 0x9c8   :  { %v1962_v46 = vpop.eup %1961 }
 0x9c9   :  { %v1234_v13 = vmul.f32 %v1962_v46, %v1958_v60  ;;  %v1573_v60 = vld [vmem:[%s2458_s12 + $0x70] sm:$0xff] }
 0x9ca   :  { %v1964_v47 = vpop.eup %1963 }
 0x9cb   :  { %v1232_v12 = vmul.f32 %v1964_v47, %v1960_v53  ;;  %v1571_v53 = vld [vmem:[%s2458_s12 + $0x60] sm:$0xff] }
 0x9cd   :  { %1857 = vmatprep.mubr.msk.f32.mxu0 %vm361_vm2, %v1232_v12 }
 0x9ce   :  { %1858 = vmatmul.mubr.msk.f32.vlgmr.msra.gmra.mxu0 %vm361_vm2, %v1234_v13 }
 0x9cf   :  { %1861 = vmatpush3.msra.mxu0 %v268_v0 }
 0x9d0   :  { %1876 = vmatprep.subr.mxu0 %v1574_v59 }
 0xa32   :  { %v1845_v14 = vpop.f32.mrf.mxu0 }
 0xa33   :  { %v1121_v15 = vadd.f32 %v1845_v14, %v838_v4  ;;  %v1566_v4 = vld [vmem:[%s2458_s12 + $0x38] sm:$0xff] }
 0xa34   :  { %v1111_v16 = vpop.f32.mrf.mxu0 }
 0xa35   :  { %v1120_v20 = vadd.f32 %v1111_v16, %v837_v6  ;;  %v1564_v6 = vld [vmem:[%s2458_s12 + $0x28] sm:$0xff] }
 0xa8e   :  { %v1859_v17 = vpop.f32.mrf.mxu0 }
 0xa90   :  { %v1313_v18 = vpop.f32.mrf.mxu0 }
 0xa91   :  { %1862 = vmatprep.mubr.msk.f32.mxu0 %vm275_vm1, %v1313_v18 }
 0xa92   :  { %1863 = vmatmul.mubr.msk.f32.vlgmr.msra.gmra.mxu0 %vm275_vm1, %v1859_v17 }
 0xa93   :  { %1877 = vmatpush3.msra.mxu0 %v1574_v59 }
 0xa94   :  { %1878 = vmatprep.subr.mxu0 %v1573_v60 }
 0xa95   :  { %1879 = vmatpush3.msra.mxu0 %v1573_v60 }
 0xa96   :  { %1880 = vmatprep.subr.mxu0 %v1572_v61 }
 0xa97   :  { %1881 = vmatpush3.msra.mxu0 %v1572_v61 }
 0xa98   :  { %1882 = vmatprep.subr.mxu0 %v1571_v53 }
 0xa99   :  { %1883 = vmatpush3.msra.mxu0 %v1571_v53 }
 0xa9a   :  { %1884 = vmatprep.subr.mxu0 %v1570_v62 }
 0xa9b   :  { %1885 = vmatpush3.msra.mxu0 %v1570_v62 }
 0xa9c   :  { %1886 = vmatprep.subr.mxu0 %v1569_v58 }
 0xa9d   :  { %1887 = vmatpush3.msra.mxu0 %v1569_v58 }
 0xa9e   :  { %1888 = vmatprep.subr.mxu0 %v1568_v63 }
 0xa9f   :  { %1889 = vmatpush3.msra.mxu0 %v1568_v63 }
 0xaa0   :  { %1890 = vmatprep.subr.mxu0 %v1567_v2 }
 0xaa1   :  { %1891 = vmatpush3.msra.mxu0 %v1567_v2 }
 0xaa2   :  { %1892 = vmatprep.subr.mxu0 %v1566_v4 }
 0xaa3   :  { %1893 = vmatpush3.msra.mxu0 %v1566_v4 }
 0xaa4   :  { %1894 = vmatprep.subr.mxu0 %v1565_v5 }
 0xaa5   :  { %1895 = vmatpush3.msra.mxu0 %v1565_v5 }
 0xaa6   :  { %1896 = vmatprep.subr.mxu0 %v1564_v6 }
 0xaa7   :  { %1897 = vmatpush3.msra.mxu0 %v1564_v6 }
 0xaa8   :  { %1898 = vmatprep.subr.mxu0 %v1563_v8 }
 0xaa9   :  { %1899 = vmatpush3.msra.mxu0 %v1563_v8 }
 0xaaa   :  { %1900 = vmatprep.subr.mxu0 %v1562_v10 }
 0xaab   :  { %1901 = vmatpush3.msra.mxu0 %v1562_v10 }
 0xaac   :  { %1902 = vmatprep.subr.mxu0 %v1561_v11 }
 0xaad   :  { %1903 = vmatpush3.msra.mxu0 %v1561_v11 }
 0xaae   :  { %1904 = vmatprep.subr.mxu0 %v1560_v42 }
 0xaaf   :  { %1905 = vmatpush3.msra.mxu0 %v1560_v42 }
 0xab0   :  { %1906 = vmatprep.subr.mxu0 %v1559_v44 }
 0xab1   :  { %1907 = vmatpush3.msra.mxu0 %v1559_v44 }
 0xb52   :  { %v1864_v19 = vpop.f32.mrf.mxu0 }
 0xb53   :  { %v2350_v21 = vadd.f32 %v1864_v19, %v1121_v15 }
 0xb54   :  { %v1394_v3 = vpop.f32.mrf.mxu0 }
 0xb55   :  { %v2352_v22 = vadd.f32 %v1394_v3, %v1120_v20  ;;  %v1408_v23 = vsel %vm78_vm0, %v2350_v21, 0.0 }
 0xb56   :  { %1409 = vadd.xlane.f32.xlu0 %v1408_v23 }
 0xb57   :  { %v1405_v24 = vsel %vm78_vm0, %v2352_v22, 0.0 }
 0xb58   :  { %1406 = vadd.xlane.f32.xlu1 %v1405_v24 }
 0xbdf   :  { %v1410_v25 = vpop.xlane.xlu0 %1409 }
 0xbe0   :  { %v1412_v26 = vmul.f32 0.03125, %v1410_v25 }
 0xbe1   :  { %v1407_v27 = vpop.xlane.xlu1 %1406 }
 0xbe2   :  { %v1414_v28 = vsub.f32 %v2350_v21, %v1412_v26  ;;  %v1411_v29 = vmul.f32 0.03125, %v1407_v27 }
 0xbe4   :  { %v1413_v30 = vsub.f32 %v2352_v22, %v1411_v29  ;;  %v1416_v31 = vmul.f32 %v1414_v28, %v1414_v28 }
 0xbe6   :  { %v1420_v32 = vsel %vm78_vm0, %v1416_v31, 0.0  ;;  %v1415_v33 = vmul.f32 %v1413_v30, %v1413_v30 }
 0xbe7   :  { %1421 = vadd.xlane.f32.xlu1 %v1420_v32  ;;  %v1720_v32 = vld [vmem:[%s2459_s13] ss:$0 sm:$0xff] }
 0xbe8   :  { %v1417_v34 = vsel %vm78_vm0, %v1415_v33, 0.0 }
 0xbe9   :  { %1418 = vadd.xlane.f32.xlu0 %v1417_v34 }
 0xc70   :  { %v1422_v39 = vpop.xlane.xlu1 %1421 }
 0xc71   :  { %v1424_v40 = vmul.f32 0.03125, %v1422_v39 }
 0xc72   :  { %v1419_v41 = vpop.xlane.xlu0 %1418 }
 0xc73   :  { %v1426_v43 = vadd.f32 1e-05, %v1424_v40  ;;  %v1423_v7 = vmul.f32 0.03125, %v1419_v41 }
 0xc75   :  { %1965 = vrsqrt.f32 %v1426_v43  ;;  %v1425_v45 = vadd.f32 1e-05, %v1423_v7 }
 0xc77   :  { %1967 = vrsqrt.f32 %v1425_v45 }
 0xc82   :  { %v1966_v9 = vpop.eup %1965 }
 0xc83   :  { %v1430_v48 = vmul.f32 %v1966_v9, %v1414_v28 }
 0xc84   :  { %v1968_v50 = vpop.eup %1967 }
 0xc85   :  { %v1429_v51 = vmul.f32 %v1968_v50, %v1413_v30  ;;  %v1439_v52 = vmul.f32 %v1715_v49, %v1430_v48 }
 0xc87   :  { %v1438_v54 = vmul.f32 %v1715_v49, %v1429_v51  ;;  %v1448_v57 = vadd.f32 %v1716_v55, %v1439_v52 }
 0xc89   :  { %v1447_v56 = vadd.f32 %v1716_v55, %v1438_v54 }
 0xc8b   :  { %1873 = vmatprep.mubr.msk.f32.mxu1 %vm78_vm0, %v1447_v56 }
 0xc8c   :  { %1874 = vmatmul.mubr.msk.f32.vlgmr.msra.gmra.mxu1 %vm78_vm0, %v1448_v57 }
 0xd4c   :  { %v1875_v0 = vpop.f32.mrf.mxu1 }
 0xd4d   :  { %v1538_v46 = vadd.f32 %v1875_v0, %v1717_v1 }
 0xd4e   :  { %v1532_v47 = vpop.f32.mrf.mxu1 }
 0xd4f   :  { %v1544_v12 = vmul.f32 0.044715, %v1538_v46  ;;  %v1533_v13 = vadd.f32 %v1717_v1, %v1532_v47  ;;  %v1542_v29 = vmul.f32 0.5, %v1538_v46 }
 0xd51   :  { %v1546_v14 = vmul.f32 %v1544_v12, %v1538_v46  ;;  %v1543_v15 = vmul.f32 0.044715, %v1533_v13  ;;  %v1541_v27 = vmul.f32 0.5, %v1533_v13 }
 0xd53   :  { %v1548_v16 = vmul.f32 %v1546_v14, %v1538_v46  ;;  %v1545_v17 = vmul.f32 %v1543_v15, %v1533_v13 }
 0xd55   :  { %v1550_v18 = vadd.f32 %v1548_v16, %v1538_v46  ;;  %v1547_v19 = vmul.f32 %v1545_v17, %v1533_v13 }
 0xd57   :  { %v1549_v20 = vadd.f32 %v1547_v19, %v1533_v13  ;;  %v1552_v3 = vmul.f32 0.7978846, %v1550_v18 }
 0xd59   :  { %v1551_v23 = vmul.f32 0.7978846, %v1549_v20  ;;  %1969 = vtanh.f32 %v1552_v3 }
 0xd5b   :  { %1971 = vtanh.f32 %v1551_v23 }
 0xd66   :  { %v1970_v24 = vpop.eup %1969 }
 0xd67   :  { %v1556_v26 = vadd.f32 1.0, %v1970_v24 }
 0xd68   :  { %v1972_v25 = vpop.eup %1971 }
 0xd69   :  { %v1555_v28 = vadd.f32 1.0, %v1972_v25  ;;  %v1558_v31 = vmul.f32 %v1556_v26, %v1542_v29 }
 0xd6b   :  { %v1557_v30 = vmul.f32 %v1555_v28, %v1541_v27 }
 0xd6d   :  { %1908 = vmatprep.mubr.f32.mxu0 %v1557_v30 }
 0xd6e   :  { %1909 = vmatmul.mubr.f32.vlgmr.msra.gmra.mxu0 %v1558_v31 }
 0xe2e   :  { %v1910_v33 = vpop.f32.mrf.mxu0 }
 0xe2f   :  { %v1654_v34 = vadd.f32 %v1910_v33, %v1720_v32 }
 0xe30   :  { %v1648_v35 = vpop.f32.mrf.mxu0 }
 0xe31   :  { %v1658_v36 = vadd.f32 %v1654_v34, %v2350_v21  ;;  %v1649_v37 = vadd.f32 %v1720_v32, %v1648_v35 }
 0xe33   :  { %1660 = vst.msk [vmem:[#allocation7 + $0x8] sm:$0xff] %vm78_vm0, %v1658_v36  ;;  %v1657_v38 = vadd.f32 %v1649_v37, %v2352_v22 }
 0xe35   :  { %1659 = vst.msk [vmem:[#allocation7] sm:$0xff] %vm78_vm0, %v1657_v38 }
 0xe36   :  { %2024 = shalt.err (!%p2021_p0)
}
 0xe37   :  { %1672 = dma.vmem_to_hbm [thread:$0]  %s1667_s29, 256, %s2460_s14, [#allocation4], %s2040_s16, %s2040_s16, %s2041_s17  }
 0xe38   :  { %2037 = dma.done.wait [#allocation4], 256  }
 0xe39   :  { %2038 = vsyncadd [#allocation4], 4294967040 }
 0xe3a   :  { %1676 = vsyncpa [#allocation3], 1 }
 0xe3b   :  { %1677 = vsyncpa [#allocation6], 1 }
 0xe3c   :  { %1678 = vsyncpa [#allocation4], 1 }

</bundles_post_ra>
